<compile_context>
chip_gen: v5e
topology: v5e:2x2
jax: 0.10.0
libtpu: 0.0.40
codegen_flags: <defaults>
</compile_context>

<pallas_src>
import math

import jax
import jax.numpy as jnp
from jax.experimental import pallas as pl
from jax.experimental.pallas import tpu as pltpu

LATENT_SIZE = 32
HIDDEN_SIZE = 128
HIDDEN_LAYERS = 6
IN_SIZE = LATENT_SIZE + 1      # latent + reynolds
MAX_BATCH_TILE = 2048          # rows per grid step (VMEM use stays ~8-10 MiB)
MIN_ROWS_PER_SPLIT = 256       # split into >=2 tiles once B >= 2*this (v7x 2 TCs)


def normalize_reynolds(re):
    return math.log(re)


def _round_up(x, m):
    return (x + m - 1) // m * m


def _choose_tiling(b):
    """Balanced, sublane-aligned batch tiling."""
    b8 = _round_up(b, 8)
    n_tiles = pl.cdiv(b8, MAX_BATCH_TILE)
    if b >= 2 * MIN_ROWS_PER_SPLIT:
        n_tiles = max(n_tiles, 2)          # keep v7x's second TensorCore busy
    tb = _round_up(pl.cdiv(b, n_tiles), 8)  # <= MAX_BATCH_TILE by construction
    grid = pl.cdiv(b, tb)                   # every block starts inside the array
    return tb, grid


# ----------------------------------------------------------------------------
# Pallas kernel: 8 matmuls (bf16 operands, f32 accumulate) + SiLU in f32, all
# from VMEM-resident tiles.  Weights are resident across the batch grid.
# ----------------------------------------------------------------------------
def _silu(x):
    # f32 elementwise; the reciprocal is an EUP-approx op so the divide leaves
    # the VALU critical path (exp is on the EUP as well, mul/add on the VPU).
    return x * pl.reciprocal(1.0 + jnp.exp(-x), approx=True)


def mlp_kernel(x_ref, w_in_ref, b_in_ref, w_hid_ref, b_hid_ref,
               w_out_ref, b_out_ref, o_ref):
    # Input layer: (TB, 32) @ (32, 128) + (1, 128)   [log(re) folded into bias]
    h = jnp.dot(x_ref[...].astype(jnp.bfloat16), w_in_ref[...],
                preferred_element_type=jnp.float32) + b_in_ref[...]
    h = _silu(h)

    # 6 hidden layers: (TB, 128) @ (128, 128) + (1, 128); statically unrolled.
    for layer in range(HIDDEN_LAYERS):
        h = jnp.dot(h.astype(jnp.bfloat16), w_hid_ref[layer],
                    preferred_element_type=jnp.float32) + b_hid_ref[layer]
        h = _silu(h)

    # Output layer: (TB, 128) @ (128, 32) + (1, 32)
    o_ref[...] = (jnp.dot(h.astype(jnp.bfloat16), w_out_ref[...],
                          preferred_element_type=jnp.float32)
                  + b_out_ref[...]).astype(o_ref.dtype)


@jax.jit
def latent_stepper_forward(latent, log_re, params):
    """latent: (B, 32) f32, log_re: scalar -> (B, 32) f32."""
    w_in, b_in, w_hid, b_hid, w_out, b_out = params

    # Fold the Reynolds column into the first-layer bias:
    #   [latent, log_re] @ W_in + b_in == latent @ W_in[:32] + (b_in + log_re*W_in[32])
    # Recomputed every call so `re` is never baked into the parameters.
    b_eff = b_in + jnp.float32(log_re) * w_in[LATENT_SIZE:LATENT_SIZE + 1, :]

    # bf16 matmul operands (weights); biases stay f32.
    w_in_bf = w_in[:LATENT_SIZE].astype(jnp.bfloat16)    # (32, 128)
    w_hid_bf = w_hid.astype(jnp.bfloat16)                # (6, 128, 128)
    w_out_bf = w_out.astype(jnp.bfloat16)                # (128, 32)

    b = latent.shape[0]
    tb, grid = _choose_tiling(b)

    const2 = lambda i: (0, 0)
    const3 = lambda i: (0, 0, 0)

    return pl.pallas_call(
        mlp_kernel,
        out_shape=jax.ShapeDtypeStruct((b, LATENT_SIZE), jnp.float32),
        grid=(grid,),
        in_specs=[
            pl.BlockSpec((tb, LATENT_SIZE), lambda i: (i, 0)),            # x tile
            pl.BlockSpec((LATENT_SIZE, HIDDEN_SIZE), const2),             # w_in (resident)
            pl.BlockSpec((1, HIDDEN_SIZE), const2),                       # b_eff
            pl.BlockSpec((HIDDEN_LAYERS, HIDDEN_SIZE, HIDDEN_SIZE), const3),  # w_hid
            pl.BlockSpec((HIDDEN_LAYERS, 1, HIDDEN_SIZE), const3),        # b_hid
            pl.BlockSpec((HIDDEN_SIZE, LATENT_SIZE), const2),             # w_out
            pl.BlockSpec((1, LATENT_SIZE), const2),                       # b_out
        ],
        out_specs=pl.BlockSpec((tb, LATENT_SIZE), lambda i: (i, 0)),
        compiler_params=pltpu.CompilerParams(
            dimension_semantics=("parallel",),
            vmem_limit_bytes=32 << 20),
    )(latent, w_in_bf, b_eff, w_hid_bf, b_hid, w_out_bf, b_out)


def latent_stepper_step(latent, re, params):
    """Equivalent of LatentStepper.step (the hstack is folded into the bias)."""
    return latent_stepper_forward(latent, normalize_reynolds(re), params)


# ----------------------------------------------------------------------------
# Deterministic parameter initialization (PyTorch-style uniform fan-in init).
# ----------------------------------------------------------------------------
def init_params(key):
    def linear(key, fan_in, fan_out):
        kw, kb = jax.random.split(key)
        bound = 1.0 / math.sqrt(fan_in)
        w = jax.random.uniform(kw, (fan_in, fan_out), jnp.float32,
                               minval=-bound, maxval=bound)
        b = jax.random.uniform(kb, (1, fan_out), jnp.float32,
                               minval=-bound, maxval=bound)
        return w, b

    keys = jax.random.split(key, 2 + HIDDEN_LAYERS)
    w_in, b_in = linear(keys[0], IN_SIZE, HIDDEN_SIZE)

    w_hids, b_hids = [], []
    for l in range(HIDDEN_LAYERS):
        w, b = linear(keys[1 + l], HIDDEN_SIZE, HIDDEN_SIZE)
        w_hids.append(w)
        b_hids.append(b)
    w_hid = jnp.stack(w_hids)                       # (6, 128, 128)
    b_hid = jnp.stack(b_hids)                       # (6, 1, 128)

    w_out, b_out = linear(keys[-1], HIDDEN_SIZE, LATENT_SIZE)
    return (w_in, b_in, w_hid, b_hid, w_out, b_out)


# ----------------------------------------------------------------------------
# Pure-JAX references.
# ----------------------------------------------------------------------------
def reference_forward_f32(latent, log_re, params):
    """Exact PyTorch semantics in f32 (concat of the log(re) column)."""
    w_in, b_in, w_hid, b_hid, w_out, b_out = params
    re_col = jnp.full((latent.shape[0], 1), log_re, dtype=jnp.float32)
    h = jax.nn.silu(jnp.concatenate([latent, re_col], 1) @ w_in + b_in[0])
    for l in range(HIDDEN_LAYERS):
        h = jax.nn.silu(h @ w_hid[l] + b_hid[l, 0])
    return h @ w_out + b_out[0]


def reference_forward_bf16(latent, log_re, params):
    """Emulates the kernel's mixed precision (bf16 operands, f32 accumulate)."""
    w_in, b_in, w_hid, b_hid, w_out, b_out = params
    b_eff = b_in + jnp.float32(log_re) * w_in[LATENT_SIZE:LATENT_SIZE + 1, :]
    h = jnp.dot(latent.astype(jnp.bfloat16),
                w_in[:LATENT_SIZE].astype(jnp.bfloat16),
                preferred_element_type=jnp.float32) + b_eff
    h = jax.nn.silu(h)
    for l in range(HIDDEN_LAYERS):
        h = jnp.dot(h.astype(jnp.bfloat16), w_hid[l].astype(jnp.bfloat16),
                    preferred_element_type=jnp.float32) + b_hid[l]
        h = jax.nn.silu(h)
    return jnp.dot(h.astype(jnp.bfloat16), w_out.astype(jnp.bfloat16),
                   preferred_element_type=jnp.float32) + b_out


if __name__ == "__main__":
    key = jax.random.PRNGKey(0)
    k_param, k_latent = jax.random.split(key)

    params = init_params(k_param)
    re = 1000.0
    log_re = normalize_reynolds(re)

    # batch=8: exact single tile; batch=20: ragged single tile (partial final
    # block, no wrapper pad); batch=600: multi-step grid (2 tiles, v7x split).
    for batch in (8, 20, 600):
        latent = jax.random.normal(
            jax.random.fold_in(k_latent, batch), (batch, LATENT_SIZE), jnp.float32)

        out = latent_stepper_step(latent, re, params)
        out = jax.block_until_ready(out)
        assert out.shape == (batch, LATENT_SIZE)
        assert bool(jnp.all(jnp.isfinite(out))), f"non-finite output at batch={batch}"

        # Check vs. a reference using the same bf16/f32 mixed precision
        # (slightly loosened for the EUP-approx reciprocal in SiLU).
        ref_bf16 = reference_forward_bf16(latent, log_re, params)
        assert jnp.allclose(out, ref_bf16, atol=1e-2, rtol=1e-2), \
            f"bf16-reference mismatch at batch={batch}"

        # Looser check vs. exact f32 PyTorch semantics (bf16 operand rounding).
        ref_f32 = reference_forward_f32(latent, log_re, params)
        assert jnp.allclose(out, ref_f32, atol=3e-2, rtol=3e-2), \
            f"f32-reference mismatch at batch={batch}"

    print("KERNEL_OK")
</pallas_src>

<mosaic_0001>
module attributes {stable_mosaic.version = 11 : i64} {
  func.func @mlp_kernel(%arg0: i32, %arg1: memref<8x32xf32, #tpu.memory_space<vmem>>, %arg2: memref<32x128xbf16, #tpu.memory_space<vmem>>, %arg3: memref<1x128xf32, #tpu.memory_space<vmem>>, %arg4: memref<6x128x128xbf16, #tpu.memory_space<vmem>>, %arg5: memref<6x1x128xf32, #tpu.memory_space<vmem>>, %arg6: memref<128x32xbf16, #tpu.memory_space<vmem>>, %arg7: memref<1x32xf32, #tpu.memory_space<vmem>>, %arg8: memref<8x32xf32, #tpu.memory_space<vmem>>) attributes {dimension_semantics = [#tpu.dimension_semantics<parallel>], iteration_bounds = array<i64: 1>, scalar_prefetch = 0 : i64, scratch_operands = 0 : i64, tpu.core_type = #tpu.core_type<tc>, window_params = [{transform_indices = @transform_0, window_bounds = array<i64: 8, 32>}, {pipeline_mode = #tpu.pipeline_mode<synchronous>, transform_indices = @transform_1, window_bounds = array<i64: 32, 128>}, {pipeline_mode = #tpu.pipeline_mode<synchronous>, transform_indices = @transform_2, window_bounds = array<i64: 1, 128>}, {pipeline_mode = #tpu.pipeline_mode<synchronous>, transform_indices = @transform_3, window_bounds = array<i64: 6, 128, 128>}, {pipeline_mode = #tpu.pipeline_mode<synchronous>, transform_indices = @transform_4, window_bounds = array<i64: 6, 1, 128>}, {pipeline_mode = #tpu.pipeline_mode<synchronous>, transform_indices = @transform_5, window_bounds = array<i64: 128, 32>}, {pipeline_mode = #tpu.pipeline_mode<synchronous>, transform_indices = @transform_6, window_bounds = array<i64: 1, 32>}, {transform_indices = @transform_7, window_bounds = array<i64: 8, 32>}]} {
    %c0 = arith.constant 0 : index
    %c0_0 = arith.constant 0 : index
    %0 = vector.load %arg1[%c0, %c0_0] : memref<8x32xf32, #tpu.memory_space<vmem>>, vector<8x32xf32>
    %1 = arith.truncf %0 : vector<8x32xf32> to vector<8x32xbf16>
    %c0_1 = arith.constant 0 : index
    %c0_2 = arith.constant 0 : index
    %2 = vector.load %arg2[%c0_1, %c0_2] : memref<32x128xbf16, #tpu.memory_space<vmem>>, vector<32x128xbf16>
    %cst = arith.constant dense<0.000000e+00> : vector<8x128xf32>
    %3 = tpu.matmul %1, %2, %cst {dimension_numbers = #tpu.dot_dimension_numbers<[1], [0], [0], [1], [0, 0, 1, 1], [], []>} : vector<8x32xbf16>, vector<32x128xbf16>, vector<8x128xf32> -> vector<8x128xf32>
    %c0_3 = arith.constant 0 : index
    %c0_4 = arith.constant 0 : index
    %4 = vector.load %arg3[%c0_3, %c0_4] : memref<1x128xf32, #tpu.memory_space<vmem>>, vector<1x128xf32>
    %5 = vector.broadcast %4 : vector<1x128xf32> to vector<8x128xf32>
    %6 = arith.addf %3, %5 : vector<8x128xf32>
    %cst_5 = arith.constant 0.000000e+00 : f32
    %7 = vector.broadcast %cst_5 : f32 to vector<8x128xf32>
    %8 = arith.subf %7, %6 : vector<8x128xf32>
    %9 = math.exp %8 : vector<8x128xf32>
    %cst_6 = arith.constant 1.000000e+00 : f32
    %10 = vector.broadcast %cst_6 : f32 to vector<8x128xf32>
    %11 = arith.addf %10, %9 : vector<8x128xf32>
    %12 = tpu.reciprocal %11 {approx = true} : vector<8x128xf32> -> vector<8x128xf32>
    %13 = arith.mulf %6, %12 : vector<8x128xf32>
    %14 = arith.truncf %13 : vector<8x128xf32> to vector<8x128xbf16>
    %c0_7 = arith.constant 0 : index
    %c0_8 = arith.constant 0 : index
    %c0_9 = arith.constant 0 : index
    %15 = vector.load %arg4[%c0_7, %c0_8, %c0_9] : memref<6x128x128xbf16, #tpu.memory_space<vmem>>, vector<1x128x128xbf16>
    %16 = vector.shape_cast %15 : vector<1x128x128xbf16> to vector<128x128xbf16>
    %cst_10 = arith.constant dense<0.000000e+00> : vector<8x128xf32>
    %17 = tpu.matmul %14, %16, %cst_10 {dimension_numbers = #tpu.dot_dimension_numbers<[1], [0], [0], [1], [0, 0, 1, 1], [], []>} : vector<8x128xbf16>, vector<128x128xbf16>, vector<8x128xf32> -> vector<8x128xf32>
    %c0_11 = arith.constant 0 : index
    %c0_12 = arith.constant 0 : index
    %c0_13 = arith.constant 0 : index
    %18 = vector.load %arg5[%c0_11, %c0_12, %c0_13] : memref<6x1x128xf32, #tpu.memory_space<vmem>>, vector<1x1x128xf32>
    %19 = vector.shape_cast %18 : vector<1x1x128xf32> to vector<1x128xf32>
    %20 = vector.broadcast %19 : vector<1x128xf32> to vector<8x128xf32>
    %21 = arith.addf %17, %20 : vector<8x128xf32>
    %cst_14 = arith.constant 0.000000e+00 : f32
    %22 = vector.broadcast %cst_14 : f32 to vector<8x128xf32>
    %23 = arith.subf %22, %21 : vector<8x128xf32>
    %24 = math.exp %23 : vector<8x128xf32>
    %cst_15 = arith.constant 1.000000e+00 : f32
    %25 = vector.broadcast %cst_15 : f32 to vector<8x128xf32>
    %26 = arith.addf %25, %24 : vector<8x128xf32>
    %27 = tpu.reciprocal %26 {approx = true} : vector<8x128xf32> -> vector<8x128xf32>
    %28 = arith.mulf %21, %27 : vector<8x128xf32>
    %29 = arith.truncf %28 : vector<8x128xf32> to vector<8x128xbf16>
    %c1 = arith.constant 1 : index
    %c0_16 = arith.constant 0 : index
    %c0_17 = arith.constant 0 : index
    %30 = vector.load %arg4[%c1, %c0_16, %c0_17] : memref<6x128x128xbf16, #tpu.memory_space<vmem>>, vector<1x128x128xbf16>
    %31 = vector.shape_cast %30 : vector<1x128x128xbf16> to vector<128x128xbf16>
    %cst_18 = arith.constant dense<0.000000e+00> : vector<8x128xf32>
    %32 = tpu.matmul %29, %31, %cst_18 {dimension_numbers = #tpu.dot_dimension_numbers<[1], [0], [0], [1], [0, 0, 1, 1], [], []>} : vector<8x128xbf16>, vector<128x128xbf16>, vector<8x128xf32> -> vector<8x128xf32>
    %c1_19 = arith.constant 1 : index
    %c0_20 = arith.constant 0 : index
    %c0_21 = arith.constant 0 : index
    %33 = vector.load %arg5[%c1_19, %c0_20, %c0_21] : memref<6x1x128xf32, #tpu.memory_space<vmem>>, vector<1x1x128xf32>
    %34 = vector.shape_cast %33 : vector<1x1x128xf32> to vector<1x128xf32>
    %35 = vector.broadcast %34 : vector<1x128xf32> to vector<8x128xf32>
    %36 = arith.addf %32, %35 : vector<8x128xf32>
    %cst_22 = arith.constant 0.000000e+00 : f32
    %37 = vector.broadcast %cst_22 : f32 to vector<8x128xf32>
    %38 = arith.subf %37, %36 : vector<8x128xf32>
    %39 = math.exp %38 : vector<8x128xf32>
    %cst_23 = arith.constant 1.000000e+00 : f32
    %40 = vector.broadcast %cst_23 : f32 to vector<8x128xf32>
    %41 = arith.addf %40, %39 : vector<8x128xf32>
    %42 = tpu.reciprocal %41 {approx = true} : vector<8x128xf32> -> vector<8x128xf32>
    %43 = arith.mulf %36, %42 : vector<8x128xf32>
    %44 = arith.truncf %43 : vector<8x128xf32> to vector<8x128xbf16>
    %c2 = arith.constant 2 : index
    %c0_24 = arith.constant 0 : index
    %c0_25 = arith.constant 0 : index
    %45 = vector.load %arg4[%c2, %c0_24, %c0_25] : memref<6x128x128xbf16, #tpu.memory_space<vmem>>, vector<1x128x128xbf16>
    %46 = vector.shape_cast %45 : vector<1x128x128xbf16> to vector<128x128xbf16>
    %cst_26 = arith.constant dense<0.000000e+00> : vector<8x128xf32>
    %47 = tpu.matmul %44, %46, %cst_26 {dimension_numbers = #tpu.dot_dimension_numbers<[1], [0], [0], [1], [0, 0, 1, 1], [], []>} : vector<8x128xbf16>, vector<128x128xbf16>, vector<8x128xf32> -> vector<8x128xf32>
    %c2_27 = arith.constant 2 : index
    %c0_28 = arith.constant 0 : index
    %c0_29 = arith.constant 0 : index
    %48 = vector.load %arg5[%c2_27, %c0_28, %c0_29] : memref<6x1x128xf32, #tpu.memory_space<vmem>>, vector<1x1x128xf32>
    %49 = vector.shape_cast %48 : vector<1x1x128xf32> to vector<1x128xf32>
    %50 = vector.broadcast %49 : vector<1x128xf32> to vector<8x128xf32>
    %51 = arith.addf %47, %50 : vector<8x128xf32>
    %cst_30 = arith.constant 0.000000e+00 : f32
    %52 = vector.broadcast %cst_30 : f32 to vector<8x128xf32>
    %53 = arith.subf %52, %51 : vector<8x128xf32>
    %54 = math.exp %53 : vector<8x128xf32>
    %cst_31 = arith.constant 1.000000e+00 : f32
    %55 = vector.broadcast %cst_31 : f32 to vector<8x128xf32>
    %56 = arith.addf %55, %54 : vector<8x128xf32>
    %57 = tpu.reciprocal %56 {approx = true} : vector<8x128xf32> -> vector<8x128xf32>
    %58 = arith.mulf %51, %57 : vector<8x128xf32>
    %59 = arith.truncf %58 : vector<8x128xf32> to vector<8x128xbf16>
    %c3 = arith.constant 3 : index
    %c0_32 = arith.constant 0 : index
    %c0_33 = arith.constant 0 : index
    %60 = vector.load %arg4[%c3, %c0_32, %c0_33] : memref<6x128x128xbf16, #tpu.memory_space<vmem>>, vector<1x128x128xbf16>
    %61 = vector.shape_cast %60 : vector<1x128x128xbf16> to vector<128x128xbf16>
    %cst_34 = arith.constant dense<0.000000e+00> : vector<8x128xf32>
    %62 = tpu.matmul %59, %61, %cst_34 {dimension_numbers = #tpu.dot_dimension_numbers<[1], [0], [0], [1], [0, 0, 1, 1], [], []>} : vector<8x128xbf16>, vector<128x128xbf16>, vector<8x128xf32> -> vector<8x128xf32>
    %c3_35 = arith.constant 3 : index
    %c0_36 = arith.constant 0 : index
    %c0_37 = arith.constant 0 : index
    %63 = vector.load %arg5[%c3_35, %c0_36, %c0_37] : memref<6x1x128xf32, #tpu.memory_space<vmem>>, vector<1x1x128xf32>
    %64 = vector.shape_cast %63 : vector<1x1x128xf32> to vector<1x128xf32>
    %65 = vector.broadcast %64 : vector<1x128xf32> to vector<8x128xf32>
    %66 = arith.addf %62, %65 : vector<8x128xf32>
    %cst_38 = arith.constant 0.000000e+00 : f32
    %67 = vector.broadcast %cst_38 : f32 to vector<8x128xf32>
    %68 = arith.subf %67, %66 : vector<8x128xf32>
    %69 = math.exp %68 : vector<8x128xf32>
    %cst_39 = arith.constant 1.000000e+00 : f32
    %70 = vector.broadcast %cst_39 : f32 to vector<8x128xf32>
    %71 = arith.addf %70, %69 : vector<8x128xf32>
    %72 = tpu.reciprocal %71 {approx = true} : vector<8x128xf32> -> vector<8x128xf32>
    %73 = arith.mulf %66, %72 : vector<8x128xf32>
    %74 = arith.truncf %73 : vector<8x128xf32> to vector<8x128xbf16>
    %c4 = arith.constant 4 : index
    %c0_40 = arith.constant 0 : index
    %c0_41 = arith.constant 0 : index
    %75 = vector.load %arg4[%c4, %c0_40, %c0_41] : memref<6x128x128xbf16, #tpu.memory_space<vmem>>, vector<1x128x128xbf16>
    %76 = vector.shape_cast %75 : vector<1x128x128xbf16> to vector<128x128xbf16>
    %cst_42 = arith.constant dense<0.000000e+00> : vector<8x128xf32>
    %77 = tpu.matmul %74, %76, %cst_42 {dimension_numbers = #tpu.dot_dimension_numbers<[1], [0], [0], [1], [0, 0, 1, 1], [], []>} : vector<8x128xbf16>, vector<128x128xbf16>, vector<8x128xf32> -> vector<8x128xf32>
    %c4_43 = arith.constant 4 : index
    %c0_44 = arith.constant 0 : index
    %c0_45 = arith.constant 0 : index
    %78 = vector.load %arg5[%c4_43, %c0_44, %c0_45] : memref<6x1x128xf32, #tpu.memory_space<vmem>>, vector<1x1x128xf32>
    %79 = vector.shape_cast %78 : vector<1x1x128xf32> to vector<1x128xf32>
    %80 = vector.broadcast %79 : vector<1x128xf32> to vector<8x128xf32>
    %81 = arith.addf %77, %80 : vector<8x128xf32>
    %cst_46 = arith.constant 0.000000e+00 : f32
    %82 = vector.broadcast %cst_46 : f32 to vector<8x128xf32>
    %83 = arith.subf %82, %81 : vector<8x128xf32>
    %84 = math.exp %83 : vector<8x128xf32>
    %cst_47 = arith.constant 1.000000e+00 : f32
    %85 = vector.broadcast %cst_47 : f32 to vector<8x128xf32>
    %86 = arith.addf %85, %84 : vector<8x128xf32>
    %87 = tpu.reciprocal %86 {approx = true} : vector<8x128xf32> -> vector<8x128xf32>
    %88 = arith.mulf %81, %87 : vector<8x128xf32>
    %89 = arith.truncf %88 : vector<8x128xf32> to vector<8x128xbf16>
    %c5 = arith.constant 5 : index
    %c0_48 = arith.constant 0 : index
    %c0_49 = arith.constant 0 : index
    %90 = vector.load %arg4[%c5, %c0_48, %c0_49] : memref<6x128x128xbf16, #tpu.memory_space<vmem>>, vector<1x128x128xbf16>
    %91 = vector.shape_cast %90 : vector<1x128x128xbf16> to vector<128x128xbf16>
    %cst_50 = arith.constant dense<0.000000e+00> : vector<8x128xf32>
    %92 = tpu.matmul %89, %91, %cst_50 {dimension_numbers = #tpu.dot_dimension_numbers<[1], [0], [0], [1], [0, 0, 1, 1], [], []>} : vector<8x128xbf16>, vector<128x128xbf16>, vector<8x128xf32> -> vector<8x128xf32>
    %c5_51 = arith.constant 5 : index
    %c0_52 = arith.constant 0 : index
    %c0_53 = arith.constant 0 : index
    %93 = vector.load %arg5[%c5_51, %c0_52, %c0_53] : memref<6x1x128xf32, #tpu.memory_space<vmem>>, vector<1x1x128xf32>
    %94 = vector.shape_cast %93 : vector<1x1x128xf32> to vector<1x128xf32>
    %95 = vector.broadcast %94 : vector<1x128xf32> to vector<8x128xf32>
    %96 = arith.addf %92, %95 : vector<8x128xf32>
    %cst_54 = arith.constant 0.000000e+00 : f32
    %97 = vector.broadcast %cst_54 : f32 to vector<8x128xf32>
    %98 = arith.subf %97, %96 : vector<8x128xf32>
    %99 = math.exp %98 : vector<8x128xf32>
    %cst_55 = arith.constant 1.000000e+00 : f32
    %100 = vector.broadcast %cst_55 : f32 to vector<8x128xf32>
    %101 = arith.addf %100, %99 : vector<8x128xf32>
    %102 = tpu.reciprocal %101 {approx = true} : vector<8x128xf32> -> vector<8x128xf32>
    %103 = arith.mulf %96, %102 : vector<8x128xf32>
    %104 = arith.truncf %103 : vector<8x128xf32> to vector<8x128xbf16>
    %c0_56 = arith.constant 0 : index
    %c0_57 = arith.constant 0 : index
    %105 = vector.load %arg6[%c0_56, %c0_57] : memref<128x32xbf16, #tpu.memory_space<vmem>>, vector<128x32xbf16>
    %cst_58 = arith.constant dense<0.000000e+00> : vector<8x32xf32>
    %106 = tpu.matmul %104, %105, %cst_58 {dimension_numbers = #tpu.dot_dimension_numbers<[1], [0], [0], [1], [0, 0, 1, 1], [], []>} : vector<8x128xbf16>, vector<128x32xbf16>, vector<8x32xf32> -> vector<8x32xf32>
    %c0_59 = arith.constant 0 : index
    %c0_60 = arith.constant 0 : index
    %107 = vector.load %arg7[%c0_59, %c0_60] : memref<1x32xf32, #tpu.memory_space<vmem>>, vector<1x32xf32>
    %108 = vector.broadcast %107 : vector<1x32xf32> to vector<8x32xf32>
    %109 = arith.addf %106, %108 : vector<8x32xf32>
    %c0_61 = arith.constant 0 : index
    %c0_62 = arith.constant 0 : index
    %110 = vector.load %arg8[%c0_61, %c0_62] : memref<8x32xf32, #tpu.memory_space<vmem>>, vector<8x32xf32>
    tpu.vector_store %arg8[%c0_61, %c0_62], %109 {strides = array<i32>} : memref<8x32xf32, #tpu.memory_space<vmem>>, vector<8x32xf32>,
    return
  }
  func.func @transform_0(%arg0: i32) -> (i32, i32) {
    %c0_i32 = arith.constant 0 : i32
    %c0_i32_0 = arith.constant 0 : i32
    return %arg0, %c0_i32 : i32, i32
  }
  func.func @transform_1(%arg0: i32) -> (i32, i32) {
    %c0_i32 = arith.constant 0 : i32
    %c0_i32_0 = arith.constant 0 : i32
    %c0_i32_1 = arith.constant 0 : i32
    return %c0_i32, %c0_i32_0 : i32, i32
  }
  func.func @transform_2(%arg0: i32) -> (i32, i32) {
    %c0_i32 = arith.constant 0 : i32
    %c0_i32_0 = arith.constant 0 : i32
    %c0_i32_1 = arith.constant 0 : i32
    return %c0_i32, %c0_i32_0 : i32, i32
  }
  func.func @transform_3(%arg0: i32) -> (i32, i32, i32) {
    %c0_i32 = arith.constant 0 : i32
    %c0_i32_0 = arith.constant 0 : i32
    %c0_i32_1 = arith.constant 0 : i32
    %c0_i32_2 = arith.constant 0 : i32
    return %c0_i32, %c0_i32_0, %c0_i32_1 : i32, i32, i32
  }
  func.func @transform_4(%arg0: i32) -> (i32, i32, i32) {
    %c0_i32 = arith.constant 0 : i32
    %c0_i32_0 = arith.constant 0 : i32
    %c0_i32_1 = arith.constant 0 : i32
    %c0_i32_2 = arith.constant 0 : i32
    return %c0_i32, %c0_i32_0, %c0_i32_1 : i32, i32, i32
  }
  func.func @transform_5(%arg0: i32) -> (i32, i32) {
    %c0_i32 = arith.constant 0 : i32
    %c0_i32_0 = arith.constant 0 : i32
    %c0_i32_1 = arith.constant 0 : i32
    return %c0_i32, %c0_i32_0 : i32, i32
  }
  func.func @transform_6(%arg0: i32) -> (i32, i32) {
    %c0_i32 = arith.constant 0 : i32
    %c0_i32_0 = arith.constant 0 : i32
    %c0_i32_1 = arith.constant 0 : i32
    return %c0_i32, %c0_i32_0 : i32, i32
  }
  func.func @transform_7(%arg0: i32) -> (i32, i32) {
    %c0_i32 = arith.constant 0 : i32
    %c0_i32_0 = arith.constant 0 : i32
    return %arg0, %c0_i32 : i32, i32
  }
}

</mosaic_0001>

<bundles_post_ra>
// kernel: latent_stepper_forward.1
= control target key start
LH: loop header
LB: loop body
LE: loop exit
PB: predicated region body
PF: predicated region fallthrough
CT: control target
= control target key end

     0   :  { %s1396_s0 = inlined_call_operand.vmem [shape: f32[8,32], index: 0, kind: input, shape index: {}]   ;;  %s1397_s1 = inlined_call_operand.vmem [shape: bf16[32,128], index: 1, kind: input, shape index: {}]   ;;  %s1398_s2 = inlined_call_operand.vmem [shape: f32[1,128], index: 2, kind: input, shape index: {}]   ;;  %s1399_s3 = inlined_call_operand.vmem [shape: bf16[6,128,128], index: 3, kind: input, shape index: {}]   ;;  %s1400_s4 = inlined_call_operand.vmem [shape: f32[6,1,128], index: 4, kind: input, shape index: {}]   ;;  %s1401_s5 = inlined_call_operand.vmem [shape: bf16[128,32], index: 5, kind: input, shape index: {}]   ;;  %s1402_s6 = inlined_call_operand.vmem [shape: f32[1,32], index: 6, kind: input, shape index: {}]   ;;  %s1403_s7 = inlined_call_operand.hbm [shape: f32[8,32], index: 7, kind: output, shape index: {}]  }
   0x1   :  { %v1029_v0 = vld [vmem:[%s1397_s1 + $0x8] sm:$0xff]  ;;  %v1028_v1 = vld [vmem:[%s1397_s1] sm:$0xff]  ;;  %v1037_v3 = vld [vmem:[%s1399_s3 + $0x38] sm:$0xff] }
   0x2   :  { %v28_v2 = vld [vmem:[%s1396_s0] sm:$0xff]  ;;  %60 = vmatpush.bf16.msra.mxu0 %v1029_v0  ;;  %142 = vmatpush.bf16.msra.mxu1 %v1037_v3 }
   0x3   :  { %12 = vsyncpa [#allocation3], 0  ;;  %v29_v4 = vpack.c.bf16 %v28_v2, %v28_v2  ;;  %vm50_vm0 = vcmask 261120   ;;  %v1036_v5 = vld [vmem:[%s1399_s3 + $0x30] sm:$0xff]  ;;  %v1035_v6 = vld [vmem:[%s1399_s3 + $0x28] sm:$0xff]  ;;  %s701_s29 = sshll.u32 %s1403_s7, 4  ;;  %s702_s29 = int_to_ptr.hbm [resolvable:$true] %s701_s29 }
   0x4   :  { %v1034_v7 = vld [vmem:[%s1399_s3 + $0x20] sm:$0xff]  ;;  %v1033_v8 = vld [vmem:[%s1399_s3 + $0x18] sm:$0xff]  ;;  %v1032_v9 = vld [vmem:[%s1399_s3 + $0x10] sm:$0xff] }
   0x5   :  { %v1031_v10 = vld [vmem:[%s1399_s3 + $0x8] sm:$0xff]  ;;  %v1030_v11 = vld [vmem:[%s1399_s3] sm:$0xff]  ;;  %v1045_v12 = vld [vmem:[%s1399_s3 + $0x78] sm:$0xff] }
   0x6   :  { %61 = vmatpush.bf16.msra.mxu0 %v1028_v1  ;;  %143 = vmatpush.bf16.msra.mxu1 %v1036_v5  ;;  %v1087_v13 = vld [vmem:[%s1398_s2] ss:$0 sm:$0xff]  ;;  %v1044_v24 = vld [vmem:[%s1399_s3 + $0x70] sm:$0xff]  ;;  %v1043_v25 = vld [vmem:[%s1399_s3 + $0x68] sm:$0xff]  ;;  %s1149_s2 = smov [#allocation2]  }
   0x7   :  { %232 = vmatpush.bf16.msra.mxu2 %v1045_v12  ;;  %v1042_v26 = vld [vmem:[%s1399_s3 + $0x60] sm:$0xff]  ;;  %v1041_v27 = vld [vmem:[%s1399_s3 + $0x58] sm:$0xff]  ;;  %v1040_v28 = vld [vmem:[%s1399_s3 + $0x50] sm:$0xff]  ;;  %s699_s27 = sshll.u32 %s1149_s2, 4  ;;  %s700_s27 = int_to_ptr.vmem [resolvable:$true] %s699_s27 }
   0x8   :  { %v1039_v29 = vld [vmem:[%s1399_s3 + $0x48] sm:$0xff]  ;;  %v1038_v30 = vld [vmem:[%s1399_s3 + $0x40] sm:$0xff]  ;;  %v1053_v31 = vld [vmem:[%s1399_s3 + $0xb8] sm:$0xff] }
   0x9   :  { %718 = vmatmul.msk.bf16.vlgmr.msra.gmra.mxu0 %vm50_vm0, %v29_v4  ;;  %v1088_v32 = vld [vmem:[%s1400_s4] ss:$0 sm:$0xff]  ;;  %322 = vmatpush.bf16.msra.mxu3 %v1053_v31  ;;  %v1052_v43 = vld [vmem:[%s1399_s3 + $0xb0] sm:$0xff]  ;;  %v1051_v44 = vld [vmem:[%s1399_s3 + $0xa8] sm:$0xff] }
   0xa   :  { %144 = vmatpush.bf16.msra.mxu1 %v1035_v6  ;;  %v1050_v45 = vld [vmem:[%s1399_s3 + $0xa0] sm:$0xff]  ;;  %v1049_v46 = vld [vmem:[%s1399_s3 + $0x98] sm:$0xff]  ;;  %v1048_v47 = vld [vmem:[%s1399_s3 + $0x90] sm:$0xff] }
   0xb   :  { %233 = vmatpush.bf16.msra.mxu2 %v1044_v24  ;;  %v1047_v48 = vld [vmem:[%s1399_s3 + $0x88] sm:$0xff]  ;;  %v1046_v49 = vld [vmem:[%s1399_s3 + $0x80] sm:$0xff]  ;;  %v1061_v50 = vld [vmem:[%s1399_s3 + $0xf8] sm:$0xff] }
   0xc   :  { %v1089_v51 = vld [vmem:[%s1400_s4 + $0x1] ss:$0 sm:$0xff]  ;;  %412 = vmatpush.bf16.msrb.mxu0 %v1061_v50  ;;  %v1060_v62 = vld [vmem:[%s1399_s3 + $0xf0] sm:$0xff]  ;;  %v1059_v63 = vld [vmem:[%s1399_s3 + $0xe8] sm:$0xff] }
   0xd   :  { %323 = vmatpush.bf16.msra.mxu3 %v1052_v43  ;;  %v1058_v0 = vld [vmem:[%s1399_s3 + $0xe0] sm:$0xff]  ;;  %v1057_v1 = vld [vmem:[%s1399_s3 + $0xd8] sm:$0xff]  ;;  %v1056_v2 = vld [vmem:[%s1399_s3 + $0xd0] sm:$0xff] }
   0xe   :  { %145 = vmatpush.bf16.msra.mxu1 %v1034_v7  ;;  %v1055_v3 = vld [vmem:[%s1399_s3 + $0xc8] sm:$0xff]  ;;  %v1054_v4 = vld [vmem:[%s1399_s3 + $0xc0] sm:$0xff]  ;;  %v1069_v5 = vld [vmem:[%s1399_s3 + $0x138] sm:$0xff] }
   0xf   :  { %234 = vmatpush.bf16.msra.mxu2 %v1043_v25  ;;  %v1090_v6 = vld [vmem:[%s1400_s4 + $0x2] ss:$0 sm:$0xff]  ;;  %v1077_v24 = vld [vmem:[%s1399_s3 + $0x178] sm:$0xff]  ;;  %v1091_v25 = vld [vmem:[%s1400_s4 + $0x3] ss:$0 sm:$0xff] }
  0x10   :  { %413 = vmatpush.bf16.msrb.mxu0 %v1060_v62  ;;  %v1085_v43 = vld [vmem:[%s1401_s5 + $0x38] sm:$0xff]  ;;  %v1093_v62 = vld [vmem:[%s1400_s4 + $0x5] ss:$0 sm:$0xff] }
  0x11   :  { %324 = vmatpush.bf16.msra.mxu3 %v1051_v44  ;;  %v1092_v44 = vld [vmem:[%s1400_s4 + $0x4] ss:$0 sm:$0xff] }
  0x12   :  { %146 = vmatpush.bf16.msra.mxu1 %v1033_v8 }
  0x13   :  { %235 = vmatpush.bf16.msra.mxu2 %v1042_v26 }
  0x14   :  { %414 = vmatpush.bf16.msrb.mxu0 %v1059_v63 }
  0x15   :  { %325 = vmatpush.bf16.msra.mxu3 %v1050_v45 }
  0x16   :  { %147 = vmatpush.bf16.msra.mxu1 %v1032_v9 }
  0x17   :  { %236 = vmatpush.bf16.msra.mxu2 %v1041_v27 }
  0x18   :  { %415 = vmatpush.bf16.msrb.mxu0 %v1058_v0 }
  0x19   :  { %326 = vmatpush.bf16.msra.mxu3 %v1049_v46 }
  0x1a   :  { %148 = vmatpush.bf16.msra.mxu1 %v1031_v10 }
  0x1b   :  { %237 = vmatpush.bf16.msra.mxu2 %v1040_v28 }
  0x1c   :  { %416 = vmatpush.bf16.msrb.mxu0 %v1057_v1 }
  0x1d   :  { %327 = vmatpush.bf16.msra.mxu3 %v1048_v47 }
  0x1e   :  { %149 = vmatpush.bf16.msra.mxu1 %v1030_v11 }
  0x1f   :  { %238 = vmatpush.bf16.msra.mxu2 %v1039_v29 }
  0x20   :  { %417 = vmatpush.bf16.msrb.mxu0 %v1056_v2 }
  0x21   :  { %328 = vmatpush.bf16.msra.mxu3 %v1047_v48 }
  0x22   :  { %502 = vmatpush.bf16.msrb.mxu1 %v1069_v5 }
  0x23   :  { %239 = vmatpush.bf16.msra.mxu2 %v1038_v30 }
  0x24   :  { %418 = vmatpush.bf16.msrb.mxu0 %v1055_v3 }
  0x25   :  { %329 = vmatpush.bf16.msra.mxu3 %v1046_v49 }
  0x27   :  { %592 = vmatpush.bf16.msrb.mxu2 %v1077_v24 }
  0x28   :  { %419 = vmatpush.bf16.msrb.mxu0 %v1054_v4 }
  0x29   :  { %680 = vmatpush.bf16.msrb.mxu3 %v1085_v43 }
  0x86   :  { %v63_v14 = vpop.f32.mrf.mxu0 }
  0x87   :  { %v64_v15 = vadd.f32 %v1087_v13, %v63_v14 }
  0x89   :  { %v67_v16 = vsub.f32 0.0, %v64_v15 }
  0x8b   :  { %v68_v17 = vmul.f32 1.442695, %v67_v16 }
  0x8d   :  { %1095 = vpow2.f32 %v68_v17  ;;  %v1068_v17 = vld [vmem:[%s1399_s3 + $0x130] sm:$0xff] }
  0x8e   :  { %v65_v18 = vpop.f32.mrf.mxu0  ;;  %503 = vmatpush.bf16.msrb.mxu1 %v1068_v17 }
  0x8f   :  { %v1067_v18 = vld [vmem:[%s1399_s3 + $0x128] sm:$0xff] }
  0x92   :  { %504 = vmatpush.bf16.msrb.mxu1 %v1067_v18 }
  0x93   :  { %v1096_v19 = vpop.eup %1095 }
  0x94   :  { %v70_v20 = vadd.f32 1.0, %v1096_v19  ;;  %v1066_v19 = vld [vmem:[%s1399_s3 + $0x120] sm:$0xff] }
  0x96   :  { %1097 = vrcp.f32 %v70_v20  ;;  %505 = vmatpush.bf16.msrb.mxu1 %v1066_v19  ;;  %v1065_v20 = vld [vmem:[%s1399_s3 + $0x118] sm:$0xff] }
  0x9a   :  { %506 = vmatpush.bf16.msrb.mxu1 %v1065_v20 }
  0x9c   :  { %v1098_v21 = vpop.eup %1097 }
  0x9d   :  { %v72_v22 = vmul.f32 %v1098_v21, %v64_v15  ;;  %v1064_v21 = vld [vmem:[%s1399_s3 + $0x110] sm:$0xff] }
  0x9e   :  { %507 = vmatpush.bf16.msrb.mxu1 %v1064_v21 }
  0x9f   :  { %v73_v23 = vpack.c.bf16 %v72_v22, %v72_v22  ;;  %v1063_v22 = vld [vmem:[%s1399_s3 + $0x108] sm:$0xff] }
  0xa1   :  { %150 = vmatmul.bf16.vlgmr.msra.gmra.mxu1 %v73_v23  ;;  %v1062_v23 = vld [vmem:[%s1399_s3 + $0x100] sm:$0xff] }
  0xa2   :  { %508 = vmatpush.bf16.msrb.mxu1 %v1063_v22 }
  0xa6   :  { %509 = vmatpush.bf16.msrb.mxu1 %v1062_v23 }
 0x11e   :  { %v151_v33 = vpop.f32.mrf.mxu1 }
 0x11f   :  { %v152_v34 = vadd.f32 %v1088_v32, %v151_v33 }
 0x121   :  { %v155_v35 = vsub.f32 0.0, %v152_v34 }
 0x123   :  { %v156_v36 = vmul.f32 1.442695, %v155_v35 }
 0x125   :  { %1099 = vpow2.f32 %v156_v36  ;;  %v1076_v36 = vld [vmem:[%s1399_s3 + $0x170] sm:$0xff] }
 0x126   :  { %v153_v37 = vpop.f32.mrf.mxu1  ;;  %593 = vmatpush.bf16.msrb.mxu2 %v1076_v36 }
 0x127   :  { %v1075_v37 = vld [vmem:[%s1399_s3 + $0x168] sm:$0xff] }
 0x12a   :  { %594 = vmatpush.bf16.msrb.mxu2 %v1075_v37 }
 0x12b   :  { %v1100_v38 = vpop.eup %1099 }
 0x12c   :  { %v158_v39 = vadd.f32 1.0, %v1100_v38  ;;  %v1074_v38 = vld [vmem:[%s1399_s3 + $0x160] sm:$0xff] }
 0x12e   :  { %1101 = vrcp.f32 %v158_v39  ;;  %595 = vmatpush.bf16.msrb.mxu2 %v1074_v38  ;;  %v1073_v39 = vld [vmem:[%s1399_s3 + $0x158] sm:$0xff] }
 0x132   :  { %596 = vmatpush.bf16.msrb.mxu2 %v1073_v39 }
 0x134   :  { %v1102_v40 = vpop.eup %1101 }
 0x135   :  { %v160_v41 = vmul.f32 %v1102_v40, %v152_v34  ;;  %v1072_v40 = vld [vmem:[%s1399_s3 + $0x150] sm:$0xff] }
 0x136   :  { %597 = vmatpush.bf16.msrb.mxu2 %v1072_v40 }
 0x137   :  { %v161_v42 = vpack.c.bf16 %v160_v41, %v160_v41  ;;  %v1071_v41 = vld [vmem:[%s1399_s3 + $0x148] sm:$0xff] }
 0x139   :  { %240 = vmatmul.bf16.vlgmr.msra.gmra.mxu2 %v161_v42  ;;  %v1070_v42 = vld [vmem:[%s1399_s3 + $0x140] sm:$0xff] }
 0x13a   :  { %598 = vmatpush.bf16.msrb.mxu2 %v1071_v41 }
 0x13e   :  { %599 = vmatpush.bf16.msrb.mxu2 %v1070_v42 }
 0x1bc   :  { %v241_v52 = vpop.f32.mrf.mxu2 }
 0x1bd   :  { %v242_v53 = vadd.f32 %v1089_v51, %v241_v52 }
 0x1bf   :  { %v245_v54 = vsub.f32 0.0, %v242_v53 }
 0x1c1   :  { %v246_v55 = vmul.f32 1.442695, %v245_v54 }
 0x1c3   :  { %1103 = vpow2.f32 %v246_v55  ;;  %v1084_v55 = vld [vmem:[%s1401_s5 + $0x30] sm:$0xff] }
 0x1c4   :  { %v243_v56 = vpop.f32.mrf.mxu2  ;;  %681 = vmatpush.bf16.msrb.mxu3 %v1084_v55 }
 0x1c5   :  { %v1083_v56 = vld [vmem:[%s1401_s5 + $0x28] sm:$0xff] }
 0x1c8   :  { %682 = vmatpush.bf16.msrb.mxu3 %v1083_v56 }
 0x1c9   :  { %v1104_v57 = vpop.eup %1103 }
 0x1ca   :  { %v248_v58 = vadd.f32 1.0, %v1104_v57  ;;  %v1082_v57 = vld [vmem:[%s1401_s5 + $0x20] sm:$0xff] }
 0x1cc   :  { %1105 = vrcp.f32 %v248_v58  ;;  %683 = vmatpush.bf16.msrb.mxu3 %v1082_v57  ;;  %v1081_v58 = vld [vmem:[%s1401_s5 + $0x18] sm:$0xff] }
 0x1d0   :  { %684 = vmatpush.bf16.msrb.mxu3 %v1081_v58 }
 0x1d2   :  { %v1106_v59 = vpop.eup %1105 }
 0x1d3   :  { %v250_v60 = vmul.f32 %v1106_v59, %v242_v53  ;;  %v1080_v59 = vld [vmem:[%s1401_s5 + $0x10] sm:$0xff] }
 0x1d4   :  { %685 = vmatpush.bf16.msrb.mxu3 %v1080_v59 }
 0x1d5   :  { %v251_v61 = vpack.c.bf16 %v250_v60, %v250_v60  ;;  %v1079_v60 = vld [vmem:[%s1401_s5 + $0x8] sm:$0xff] }
 0x1d7   :  { %330 = vmatmul.bf16.vlgmr.msra.gmra.mxu3 %v251_v61  ;;  %v1078_v61 = vld [vmem:[%s1401_s5] sm:$0xff] }
 0x1d8   :  { %686 = vmatpush.bf16.msrb.mxu3 %v1079_v60 }
 0x1dc   :  { %687 = vmatpush.bf16.msrb.mxu3 %v1078_v61 }
 0x25a   :  { %v331_v7 = vpop.f32.mrf.mxu3 }
 0x25b   :  { %v332_v8 = vadd.f32 %v1090_v6, %v331_v7 }
 0x25d   :  { %v335_v9 = vsub.f32 0.0, %v332_v8 }
 0x25f   :  { %v336_v10 = vmul.f32 1.442695, %v335_v9  ;;  %v1094_v9 = vld [vmem:[%s1402_s6] ss:$0 sm:$0xff] }
 0x261   :  { %1107 = vpow2.f32 %v336_v10 }
 0x262   :  { %v333_v11 = vpop.f32.mrf.mxu3 }
 0x267   :  { %v1108_v12 = vpop.eup %1107 }
 0x268   :  { %v338_v13 = vadd.f32 1.0, %v1108_v12 }
 0x26a   :  { %1109 = vrcp.f32 %v338_v13 }
 0x270   :  { %v1110_v14 = vpop.eup %1109 }
 0x271   :  { %v340_v15 = vmul.f32 %v1110_v14, %v332_v8 }
 0x273   :  { %v341_v16 = vpack.c.bf16 %v340_v15, %v340_v15 }
 0x275   :  { %420 = vmatmul.bf16.vlgmr.msrb.gmra.mxu0 %v341_v16 }
 0x2f2   :  { %v421_v26 = vpop.f32.mrf.mxu0 }
 0x2f3   :  { %v422_v27 = vadd.f32 %v1091_v25, %v421_v26 }
 0x2f5   :  { %v425_v28 = vsub.f32 0.0, %v422_v27 }
 0x2f7   :  { %v426_v29 = vmul.f32 1.442695, %v425_v28 }
 0x2f9   :  { %1111 = vpow2.f32 %v426_v29 }
 0x2fa   :  { %v423_v30 = vpop.f32.mrf.mxu0 }
 0x2ff   :  { %v1112_v31 = vpop.eup %1111 }
 0x300   :  { %v428_v32 = vadd.f32 1.0, %v1112_v31 }
 0x302   :  { %1113 = vrcp.f32 %v428_v32 }
 0x308   :  { %v1114_v33 = vpop.eup %1113 }
 0x309   :  { %v430_v34 = vmul.f32 %v1114_v33, %v422_v27 }
 0x30b   :  { %v431_v35 = vpack.c.bf16 %v430_v34, %v430_v34 }
 0x30d   :  { %510 = vmatmul.bf16.vlgmr.msrb.gmra.mxu1 %v431_v35 }
 0x38a   :  { %v511_v45 = vpop.f32.mrf.mxu1 }
 0x38b   :  { %v512_v46 = vadd.f32 %v1092_v44, %v511_v45 }
 0x38d   :  { %v515_v47 = vsub.f32 0.0, %v512_v46 }
 0x38f   :  { %v516_v48 = vmul.f32 1.442695, %v515_v47 }
 0x391   :  { %1115 = vpow2.f32 %v516_v48 }
 0x392   :  { %v513_v49 = vpop.f32.mrf.mxu1 }
 0x397   :  { %v1116_v50 = vpop.eup %1115 }
 0x398   :  { %v518_v51 = vadd.f32 1.0, %v1116_v50 }
 0x39a   :  { %1117 = vrcp.f32 %v518_v51 }
 0x3a0   :  { %v1118_v52 = vpop.eup %1117 }
 0x3a1   :  { %v520_v53 = vmul.f32 %v1118_v52, %v512_v46 }
 0x3a3   :  { %v521_v54 = vpack.c.bf16 %v520_v53, %v520_v53 }
 0x3a5   :  { %600 = vmatmul.bf16.vlgmr.msrb.gmra.mxu2 %v521_v54 }
 0x428   :  { %v601_v63 = vpop.f32.mrf.mxu2 }
 0x429   :  { %v602_v0 = vadd.f32 %v1093_v62, %v601_v63 }
 0x42b   :  { %v605_v1 = vsub.f32 0.0, %v602_v0 }
 0x42d   :  { %v606_v2 = vmul.f32 1.442695, %v605_v1 }
 0x42f   :  { %1119 = vpow2.f32 %v606_v2 }
 0x430   :  { %v603_v3 = vpop.f32.mrf.mxu2 }
 0x435   :  { %v1120_v4 = vpop.eup %1119 }
 0x436   :  { %v608_v5 = vadd.f32 1.0, %v1120_v4 }
 0x438   :  { %1121 = vrcp.f32 %v608_v5 }
 0x43e   :  { %v1122_v6 = vpop.eup %1121 }
 0x43f   :  { %v610_v7 = vmul.f32 %v1122_v6, %v602_v0 }
 0x441   :  { %v611_v8 = vpack.c.bf16 %v610_v7, %v610_v7 }
 0x443   :  { %688 = vmatmul.bf16.vlgmr.msrb.gmra.mxu3 %v611_v8 }
 0x4c6   :  { %v689_v10 = vpop.f32.mrf.mxu3 }
 0x4c7   :  { %v690_v11 = vadd.f32 %v1094_v9, %v689_v10 }
 0x4c9   :  { %693 = vst.msk [vmem:[#allocation2] sm:$0xff] %vm50_vm0, %v690_v11 }
 0x4ca   :  { %704 = dma.vmem_to_hbm [thread:$0]  %s700_s27, 128, %s702_s29, [#allocation3]  }
 0x4ce   :  { %v691_v12 = vpop.f32.mrf.mxu3 }
 0x4cf   :  { %1147 = dma.done.wait [#allocation3], 128  }
 0x4d0   :  { %1148 = vsyncadd [#allocation3], 4294967168 }
 0x4d1   :  { %709 = vsyncpa [#allocation3], 1 }

</bundles_post_ra>
